<compile_context>
chip_gen: v7x
topology: tpu7x:2x2x1
jax: 0.10.0
libtpu: 0.0.40
codegen_flags: <defaults>
</compile_context>

<pallas_src>
import jax
import jax.numpy as jnp
from jax.experimental import pallas as pl
from jax.experimental.pallas import tpu as pltpu


def _outconv_kernel(x_ref, w_ref, b_ref, o_ref):
    # x_ref: (1, C_in, TILE_HW)   VMEM tile of one image's channel x spatial slab
    # w_ref: (C_out, C_in)        full weight, resident across the grid
    # b_ref: (C_out, 1)           bias column (f32), resident
    # o_ref: (1, C_out, TILE_HW)  lane-dense output tile
    #
    # NOTE: any out-of-bounds lanes in a ragged last spatial block contain
    # garbage, but the lane axis is the matmul N-dim (no cross-lane mixing) and
    # the store back to HBM is masked, so results stay correct. Do not add a
    # cross-lane reduction here without masking first.
    x = x_ref[0]  # (C_in, TILE_HW)
    acc = jnp.dot(
        w_ref[...],
        x,
        preferred_element_type=jnp.float32,
        precision=jax.lax.Precision.HIGHEST,  # full f32 MXU passes on v5e/v6e
    )
    acc = acc + b_ref[...]  # (C_out, 1) broadcasts over the lane (spatial) axis
    o_ref[0] = acc.astype(o_ref.dtype)


def _vmem_capacity_bytes():
    """Physical per-core VMEM; fall back to the smallest (v7x: 64 MiB)."""
    try:
        return int(pltpu.get_tpu_info().vmem_capacity_bytes)
    except Exception:
        return 64 * 1024 * 1024


def _pick_tile_hw(hw, c_in, c_out, dtype_bytes, slab_budget_bytes):
    """Largest lane-dense spatial tile whose double-buffered in+out slabs fit
    the budget; prefer an exact divisor of hw so every store is unmasked."""
    hw_pad = pl.cdiv(hw, 128) * 128          # lane-padded spatial extent
    per_lane = 2 * (c_in + c_out) * dtype_bytes  # 2 bufs x (input + output) per lane
    target = max(128, (slab_budget_bytes // per_lane) // 128 * 128)
    target = min(target, hw_pad)
    if hw % 128 == 0:
        # Pick the largest multiple of 128 <= target that divides hw exactly
        # -> no ragged last block, unmasked vst on every grid step.
        best = 128
        t = 128
        while t <= target:
            if hw % t == 0:
                best = t
            t += 128
        return best
    # hw not lane-aligned (e.g. hw < 128): the last (or only) block is ragged;
    # Pallas pads the load and masks the store, which is correct.
    return target


def outconv_1x1(x_nchw, weight, bias):
    """1x1 Conv2d forward. x_nchw: (N, C_in, H, W); weight: (C_out, C_in, 1, 1);
    bias: (C_out,). Returns (N, C_out, H, W). Matches nn.Conv2d(kernel_size=1)."""
    n, c_in, h, w = x_nchw.shape
    c_out = weight.shape[0]
    hw = h * w
    dtype_bytes = jnp.dtype(x_nchw.dtype).itemsize

    # NCHW-native: spatial dims are contiguous last, so these reshapes are free.
    x3 = x_nchw.reshape(n, c_in, hw)
    w_mat = weight.reshape(c_out, c_in)
    b_col = bias.reshape(c_out, 1).astype(jnp.float32)  # f32 accumulation

    # Per-generation VMEM budgeting: ~40% of physical VMEM for the pipelined
    # slabs (<= ~25.6 MiB on v7x's 64 MiB, capped at 48 MiB on v5e/v6e's 128 MiB).
    vmem_cap = _vmem_capacity_bytes()
    slab_budget = min(vmem_cap * 2 // 5, 48 * 1024 * 1024)
    tile_hw = _pick_tile_hw(hw, c_in, c_out, dtype_bytes, slab_budget)

    # Explicit VMEM limit so the enlarged tiles compile on v5e (16 MiB scoped
    # default) and never exceed v7x's physical 64 MiB.
    needed = (
        2 * (c_in + c_out) * tile_hw * dtype_bytes  # double-buffered in/out slabs
        + 2 * (c_out * c_in + c_out) * 4            # resident weight + bias
        + (4 << 20)                                 # slack for compiler scratch
    )
    vmem_limit = min(max(needed, 32 << 20), vmem_cap)

    # Spatial-tile axis leads the grid so megacore (v7x, 2 TCs) shards it even
    # when N == 1. Both axes are independent -> fully "parallel".
    grid = (pl.cdiv(hw, tile_hw), n)

    # TODO(synk): if H*W per image is tiny and many grid steps remain, sweep
    # pipeline_mode=pl.Buffered(3) on the x BlockSpec to hide DMA issue latency.
    y3 = pl.pallas_call(
        _outconv_kernel,
        out_shape=jax.ShapeDtypeStruct((n, c_out, hw), x_nchw.dtype),
        grid_spec=pltpu.PrefetchScalarGridSpec(
            num_scalar_prefetch=0,
            grid=grid,
            in_specs=[
                pl.BlockSpec((1, c_in, tile_hw), lambda j, b: (b, 0, j)),
                pl.BlockSpec((c_out, c_in), lambda j, b: (0, 0)),
                pl.BlockSpec((c_out, 1), lambda j, b: (0, 0)),
            ],
            out_specs=pl.BlockSpec((1, c_out, tile_hw), lambda j, b: (b, 0, j)),
        ),
        compiler_params=pltpu.CompilerParams(
            dimension_semantics=("parallel", "parallel"),
            vmem_limit_bytes=int(vmem_limit),
        ),
    )(x3, w_mat, b_col)

    # Free reshape back to NCHW (channels/spatial already in the right order).
    return y3.reshape(n, c_out, h, w)


def init_outconv_params(key, in_channels, out_channels, dtype=jnp.float32):
    """Deterministic init mimicking nn.Conv2d default (uniform +/- 1/sqrt(fan_in))."""
    k_w, k_b = jax.random.split(key)
    fan_in = in_channels * 1 * 1
    bound = 1.0 / jnp.sqrt(fan_in)
    weight = jax.random.uniform(
        k_w, (out_channels, in_channels, 1, 1), dtype, minval=-bound, maxval=bound
    )
    bias = jax.random.uniform(
        k_b, (out_channels,), dtype, minval=-bound, maxval=bound
    )
    return weight, bias


if __name__ == "__main__":
    key = jax.random.PRNGKey(0)
    k_x, k_p = jax.random.split(key)

    N, C_IN, C_OUT, H, W = 2, 4, 3, 16, 16
    x = jax.random.normal(k_x, (N, C_IN, H, W), jnp.float32)
    weight, bias = init_outconv_params(k_p, C_IN, C_OUT)

    y = outconv_1x1(x, weight, bias)
    y = jax.block_until_ready(y)

    # Reference check against plain-JAX 1x1 conv (einsum over channels).
    y_ref = jnp.einsum("nchw,oc->nohw", x, weight.reshape(C_OUT, C_IN)) + bias[
        None, :, None, None
    ]
    assert y.shape == (N, C_OUT, H, W)
    assert jnp.allclose(y, y_ref, atol=1e-4, rtol=1e-4)

    print("KERNEL_OK")
</pallas_src>

<mosaic_0001>
module attributes {stable_mosaic.version = 11 : i64} {
  func.func @_outconv_kernel(%arg0: i32, %arg1: i32, %arg2: memref<1x4x256xf32, #tpu.memory_space<vmem>>, %arg3: memref<3x4xf32, #tpu.memory_space<vmem>>, %arg4: memref<3x1xf32, #tpu.memory_space<vmem>>, %arg5: memref<1x3x256xf32, #tpu.memory_space<vmem>>) attributes {dimension_semantics = [#tpu.dimension_semantics<parallel>, #tpu.dimension_semantics<parallel>], iteration_bounds = array<i64: 1, 2>, scalar_prefetch = 0 : i64, scratch_operands = 0 : i64, tpu.core_type = #tpu.core_type<tc>, window_params = [{transform_indices = @transform_0, window_bounds = array<i64: 1, 4, 256>}, {pipeline_mode = #tpu.pipeline_mode<synchronous>, transform_indices = @transform_1, window_bounds = array<i64: 3, 4>}, {pipeline_mode = #tpu.pipeline_mode<synchronous>, transform_indices = @transform_2, window_bounds = array<i64: 3, 1>}, {transform_indices = @transform_3, window_bounds = array<i64: 1, 3, 256>}]} {
    %c0 = arith.constant 0 : index
    %c0_0 = arith.constant 0 : index
    %c0_1 = arith.constant 0 : index
    %0 = vector.load %arg2[%c0, %c0_0, %c0_1] : memref<1x4x256xf32, #tpu.memory_space<vmem>>, vector<1x4x256xf32>
    %1 = vector.shape_cast %0 : vector<1x4x256xf32> to vector<4x256xf32>
    %c0_2 = arith.constant 0 : index
    %c0_3 = arith.constant 0 : index
    %2 = vector.load %arg3[%c0_2, %c0_3] : memref<3x4xf32, #tpu.memory_space<vmem>>, vector<3x4xf32>
    %cst = arith.constant dense<0.000000e+00> : vector<3x256xf32>
    %3 = tpu.matmul %2, %1, %cst {dimension_numbers = #tpu.dot_dimension_numbers<[1], [0], [0], [1], [0, 0, 1, 1], [], []>, precision = #tpu.contract_precision<fp32>} : vector<3x4xf32>, vector<4x256xf32>, vector<3x256xf32> -> vector<3x256xf32>
    %c0_4 = arith.constant 0 : index
    %c0_5 = arith.constant 0 : index
    %4 = vector.load %arg4[%c0_4, %c0_5] : memref<3x1xf32, #tpu.memory_space<vmem>>, vector<3x1xf32>
    %5 = vector.broadcast %4 : vector<3x1xf32> to vector<3x256xf32>
    %6 = arith.addf %3, %5 : vector<3x256xf32>
    %c0_6 = arith.constant 0 : index
    %c0_7 = arith.constant 0 : index
    %c0_8 = arith.constant 0 : index
    %7 = vector.load %arg5[%c0_6, %c0_7, %c0_8] : memref<1x3x256xf32, #tpu.memory_space<vmem>>, vector<1x3x256xf32>
    %8 = vector.shape_cast %7 : vector<1x3x256xf32> to vector<3x256xf32>
    %9 = vector.shape_cast %6 : vector<3x256xf32> to vector<1x3x256xf32>
    tpu.vector_store %arg5[%c0_6, %c0_7, %c0_8], %9 {strides = array<i32>} : memref<1x3x256xf32, #tpu.memory_space<vmem>>, vector<1x3x256xf32>,
    return
  }
  func.func @transform_0(%arg0: i32, %arg1: i32) -> (i32, i32, i32) {
    %c0_i32 = arith.constant 0 : i32
    %c0_i32_0 = arith.constant 0 : i32
    return %arg1, %c0_i32, %arg0 : i32, i32, i32
  }
  func.func @transform_1(%arg0: i32, %arg1: i32) -> (i32, i32) {
    %c0_i32 = arith.constant 0 : i32
    %c0_i32_0 = arith.constant 0 : i32
    %c0_i32_1 = arith.constant 0 : i32
    return %c0_i32, %c0_i32_0 : i32, i32
  }
  func.func @transform_2(%arg0: i32, %arg1: i32) -> (i32, i32) {
    %c0_i32 = arith.constant 0 : i32
    %c0_i32_0 = arith.constant 0 : i32
    %c0_i32_1 = arith.constant 0 : i32
    return %c0_i32, %c0_i32_0 : i32, i32
  }
  func.func @transform_3(%arg0: i32, %arg1: i32) -> (i32, i32, i32) {
    %c0_i32 = arith.constant 0 : i32
    %c0_i32_0 = arith.constant 0 : i32
    return %arg1, %c0_i32, %arg0 : i32, i32, i32
  }
}

</mosaic_0001>

<bundles_post_ra>
// kernel: tpu_custom_call.1
= control target key start
LH: loop header
LB: loop body
LE: loop exit
PB: predicated region body
PF: predicated region fallthrough
CT: control target
= control target key end

     0   :  { %8 = vsyncpa [#allocation3], 0  ;;  %s1123_s0 = inlined_call_operand.hbm [shape: f32[2,4,256], index: 0, kind: input, shape index: {}]   ;;  %s1124_s1 = inlined_call_operand.vmem [shape: f32[3,4], index: 1, kind: input, shape index: {}]   ;;  %s1125_s2 = inlined_call_operand.vmem [shape: f32[3,1], index: 2, kind: input, shape index: {}]   ;;  %s1126_s3 = inlined_call_operand.vmem [shape: f32[2,3,256], index: 3, kind: output, shape index: {}]  }
   0x1   :  { %10 = vsyncpa [#allocation3 + $0x1], 0  ;;  %s992_s12 = smov 0   ;;  %s994_s13 = smov 0  }
   0x2   :  { %s996_s14 = smov 0   ;;  %s998_s15 = smov 0  }
   0x3   :  { %s1000_s16 = smov 0   ;;  %s1002_s17 = smov 0  }
   0x4 LB: > { %s801_s18 = sadd.s32 4294967295, %s967_s17   ;;  %s25_s19 = sadd.s32 1, %s963_s16  ;;  %s967_s17 = sphi %s1002_s17, %s16_s17   ;;  %s963_s16 = sphi %s1000_s16, %s1136_s16   ;;  %s959_s15 = sphi %s998_s15, %s1135_s15   ;;  %s955_s14 = sphi %s996_s14, %s1134_s14   ;;  %s951_s13 = sphi %s994_s13, %s1133_s13   ;;  %s947_s12 = sphi %s992_s12, %s1132_s12  }
   0x5   : > { %p26_p0 = scmp.ge.s32.totalorder %s25_s19, 2  ;;  %s37_s20 = sadd.s32 1, %s955_s14 }
   0x6   : > { %p44_p1 = scmp.ne.s32.totalorder %s955_s14, %s951_s13  ;;  %p45_p2 = scmp.eq.s32.totalorder %s967_s17, 0 }
   0x7   : > { %s1138_s19 = smov (%p26_p0, %s25_s19), 0  ;;  %p50_p4 = scmp.ne.s32.totalorder %s951_s13, %s947_s12 }
   0x8   : > { %p1028_p3 = por %p45_p2, %p44_p1  ;;  %s32_s22 = ssub.s32 %s963_s16, %s1138_s19 }
   0x9   : > { %p51_p5 = scmp.eq.s32.totalorder %s801_s18, 0  ;;  %p35_p6 = scmp.eq.s32.totalorder %s32_s22, 0 }
   0xa   : > { %p834_p8 = scmp.lt.s32.totalorder %s967_s17, 2  ;;  %s150_s25 = sand.u32 1, %s955_s14  }
   0xb   : > { %p1035_p7 = por %p51_p5, %p50_p4  ;;  %s814_s26 = sshll.u32 %s963_s16, 7 }
   0xc   : > { %s1041_s24 = scalar_select %p35_p6, %s955_s14, %s37_s20  }
   0xd   : > { %s805_s27 = sshll.u32 %s150_s25, 3  ;;  %s1048_s30 = scalar_lea.hbm %s1123_s0, %s814_s26 }
   0xe   : > { %s154_s4 = scalar_lea.vmem [#allocation2], %s805_s27  ;;  %p1052_p9 = pnand %p834_p8, %p1028_p3 }
   0xf   : > { %s164_s5 = sshll.u32 %s154_s4, 4  ;;  %s151_s7 = scalar_lea.sflag [#allocation3], %s150_s25  ;;  %s1056_s5 = int_to_ptr.vmem [resolvable:$true] %s164_s5 }
  0x10   : > { %s887_s8 = scalar_lea.hbm %s1048_s30, 128  ;;  %p889_p13 = pneg %p1052_p9 }
  0x11   : > { %p888_p12 = scmp.ne.s32.totalorder %s1048_s30, %s887_s8  ;;  %s892_s11 = scalar_lea.hbm %s1123_s0, 256 }
  0x12   : > { %p893_p2 = scmp.lt.u32.totalorder %s1048_s30, %s1123_s0  ;;  %p894_p3 = scmp.lt.u32.totalorder %s892_s11, %s887_s8 }
  0x13   : > { %p890_p0 = pnand %p889_p13, %p888_p12  ;;  %p896_p5 = scmp.lt.u32.totalorder %s887_s8, %s1048_s30 }
  0x14   : > { %p895_p4 = por %p894_p3, %p893_p2 }
  0x15   : > { %p891_p1 = pneg %p890_p0 }
  0x16   : > { %p897_p6 = por %p896_p5, %p895_p4 }
  0x18   : > { %p898_p8 = pnand %p897_p6, %p891_p1 }
  0x1a   : > { %901 = shalt.err (!%p898_p8)
}
  0x1b   : > { %s902_s20 = scalar_lea.vmem %s1056_s5, 128  ;;  %s969_s21 = smov [#allocation2]  }
  0x1c   : > { %p903_p12 = scmp.ne.s32.totalorder %s1056_s5, %s902_s20  ;;  %s907_s22 = sshll.u32 %s969_s21, 4  ;;  %s908_s22 = int_to_ptr.vmem [resolvable:$false] %s907_s22 }
  0x1d   : > { %s909_s25 = scalar_lea.vmem %s908_s22, 256  ;;  %p910_p11 = scmp.lt.s32.totalorder %s1056_s5, %s908_s22 }
  0x1e   : > { %p905_p0 = pnand %p903_p12, %p889_p13  ;;  %p911_p2 = scmp.lt.s32.totalorder %s909_s25, %s902_s20 }
  0x20   : > { %p906_p10 = pneg %p905_p0  ;;  %p912_p3 = por %p911_p2, %p910_p11 }
  0x22   : > { %p913_p4 = pnand %p912_p3, %p906_p10 }
  0x24   : > { %916 = shalt.err (!%p913_p4)
}
  0x25   : > { %833 = dma.hbm_to_vmem [thread:$0]  (!%p1052_p9), %s1048_s30, 128, %s1056_s5, %s151_s7  }
  0x26   : > { %p1130_p1 = scmp.lt.s32.totalorder %s967_s17, 3  ;;  %p1131_p5 = scmp.ge.s32.totalorder %s967_s17, 1 }
  0x28   : > { %p170_p13 = pnand %p1131_p5, %p1130_p1 }
  0x29   : > { %s175_s26 = sand.u32 (!%p170_p13), 1, %s951_s13  }
  0x2a   : > { %173 = sbr.rel (%p170_p13) target bundleno = 299 (0x12b), region = 32  ;;  %s809_s27 = sshll.u32 (!%p170_p13), %s175_s26, 3 }
  0x2b   : > { %s176_s28 = scalar_lea.sflag (!%p170_p13), [#allocation3], %s175_s26  ;;  %s179_s29 = scalar_lea.vmem (!%p170_p13), [#allocation2], %s809_s27 }
  0x31   : > { %942 = dma.done.wait (%p1035_p7), %s176_s28, 128  }
  0x32   : > { %944 = vsyncadd (%p1035_p7), %s176_s28, 4294967168  ;;  %v970_v0 = vmov 0.0   ;;  %v971_v1 = vmov 0   ;;  %vm231_vm0 = vcmask 1043456   ;;  %vm227_vm1 = vcmask 31744   ;;  %v217_v2 = vld [vmem:[%s179_s29] sm:$0xff] }
  0x33   : > { %539 = vmatprep.mubr.f32.mxu0 %v970_v0  ;;  %302 = vmatprep.mubr.f32.mxu1 %v970_v0  ;;  %v218_v3 = vld [vmem:[%s1124_s1] sm:$0x7]  ;;  %v226_v5 = vcombine.high %v217_v2, %v217_v2  ;;  %v232_v6 = vsel %vm231_vm0, %v217_v2, 0  ;;  %p208_p7 = scmp.lt.s32.totalorder %s959_s15, 1 }
  0x34   : > { %885 = vset.pattern.permute.xlu0 %v971_v1  ;;  %v219_v4 = vld [vmem:[%s1125_s2] sm:$0x7]  ;;  %v229_v7 = vsel %vm227_vm1, %v218_v3, 0  ;;  %v238_v8 = vand.u32 4294901760, %v232_v6 }
  0x35   : > { %222 = vperm.xlu0 %885, %v219_v4   ;;  %v303_v9 = vand.u32 4294901760, %v229_v7  ;;  %v234_v10 = vsel %vm231_vm0, %v226_v5, 0  ;;  %s1140_s15 = smov (!%p208_p7, %s959_s15), 1 }
  0x36   : > { %v236_v11 = vand.u32 4294901760, %v234_v10  ;;  %v321_v12 = vsub.f32 %v232_v6, %v238_v8  ;;  %s815_s23 = sshll.u32 %s1140_s15, 3 }
  0x37   : > { %v304_v13 = vsub.f32 %v229_v7, %v303_v9  ;;  %s215_s9 = scalar_lea.vmem %s1126_s3, %s815_s23 }
  0x38   : > { %474 = vmatprep.subr.mxu0 %v236_v11  ;;  %237 = vmatprep.subr.mxu1 %v236_v11  ;;  %v315_v15 = vsub.f32 %v234_v10, %v236_v11  ;;  %v322_v16 = vand.u32 4294901760, %v321_v12 }
  0x39   : > { %v305_v14 = vand.u32 4294901760, %v304_v13  ;;  %476 = vmatpush1.msra.mxu0 %v238_v8  ;;  %239 = vmatpush1.msra.mxu1 %v238_v8 }
  0x3a   : > { %v316_v18 = vand.u32 4294901760, %v315_v15  ;;  %v323_v19 = vsub.f32 %v321_v12, %v322_v16 }
  0x3b   : > { %543 = vmatmul.mubr.f32.vlgmr.msra.gmra.mrb[0].mxu0 %v305_v14  ;;  %v306_v17 = vsub.f32 %v304_v13, %v305_v14 }
  0x3c   : > { %619 = vmatprep.mubr.f32.mxu0 %v970_v0  ;;  %v317_v21 = vsub.f32 %v315_v15, %v316_v18  ;;  %552 = vmatprep.subr.mxu0 %v316_v18  ;;  %v324_v22 = vand.u32 4294901760, %v323_v19 }
  0x3d   : > { %v307_v20 = vand.u32 4294901760, %v306_v17  ;;  %556 = vmatpush1.msra.mxu0 %v322_v16 }
  0x3e   : > { %v318_v23 = vand.u32 4294901760, %v317_v21  ;;  %628 = vmatprep.subr.mxu0 %v236_v11 }
  0x3f   : > { %308 = vmatmul.mubr.f32.vlgmr.msra.gmra.mrb[0].mxu1 %v307_v20 }
  0x40   : > { %388 = vmatprep.mubr.f32.mxu1 %v970_v0  ;;  %319 = vmatprep.subr.mxu1 %v318_v23 }
  0x41   : > { %325 = vmatpush1.msra.mxu1 %v324_v22 }
  0x42   : > { %398 = vmatprep.subr.mxu1 %v315_v15 }
  0x43   : > { %621 = vmatmul.mubr.f32.vlgmr.msra.gmra.mrb[0].mxu0 %v303_v9 }
  0x44   : > { %630 = vmatpush1.msra.mxu0 %v238_v8  ;;  %693 = vmatprep.mubr.f32.mxu0 %v970_v0 }
  0x47   : > { %390 = vmatmul.mubr.f32.vlgmr.msra.gmra.mrb[0].mxu1 %v303_v9 }
  0x48   : > { %401 = vmatpush1.msra.mxu1 %v321_v12  ;;  %464 = vmatprep.mubr.f32.mxu1 %v970_v0 }
  0x4b   : > { %695 = vmatmul.mubr.f32.vlgmr.msra.gmra.mrb[0].mxu0 %v303_v9 }
  0x4f   : > { %467 = vmatmul.mubr.f32.vlgmr.msra.gmra.mrb[0].mxu1 %v304_v13 }
  0xb4   : > { %v223_v26 = vpop.permute.xlu0 %222 }
 0x11e   : > { %v696_v24 = vpop.f32.mrb[0].mxu0 }
 0x11f   : > { %v698_v25 = vpop.f32.mrb[1].mxu0 }
 0x122   : > { %v468_v27 = vpop.f32.mrb[0].mxu1 }
 0x123   : > { %v816_v28 = vadd.f32 %v468_v27, %v223_v26  ;;  %v470_v29 = vpop.f32.mrb[1].mxu1 }
 0x124   : > { %v818_v30 = vadd.f32 %v470_v29, %v223_v26 }
 0x125   : > { %v817_v31 = vadd.f32 %v816_v28, %v696_v24 }
 0x126   : > { %v819_v32 = vadd.f32 %v818_v30, %v698_v25 }
 0x128   : > { %v703_v33 = vcombine.low %v817_v31, %v819_v32 }
 0x12a   : > { %705 = vst [vmem:[%s215_s9] sm:$0x77] %v703_v33 }
 0x12b PF: > { %s16_s17 = sadd.s32 1, %s967_s17   ;;  %s1132_s12 = smov %s951_s13 }
 0x12c   : > { %p13_p9 = scmp.ge.s32.totalorder %s16_s17, 4   ;;  %s1133_s13 = smov %s955_s14 }
 0x12d   : > { %s1134_s14 = smov %s1041_s24  ;;  %s1135_s15 = smov %s963_s16 }
 0x12e   : > { %s1136_s16 = smov %s1138_s19  ;;  %15 = sbr.rel (!%p13_p9) target bundleno = 4 (0x4), region = 72 }
 0x135   :  { %736 = vsyncpa [#allocation3], 1 }
 0x136   :  { %738 = vsyncpa [#allocation3 + $0x1], 1 }

</bundles_post_ra>
